<compile_context>
chip_gen: v5e
topology: v5e:2x2
jax: 0.10.0
libtpu: 0.0.40
codegen_flags: <defaults>
</compile_context>

<pallas_src>
import functools
import math

import jax
import jax.numpy as jnp
from jax.experimental import pallas as pl
from jax.experimental.pallas import tpu as pltpu

# The previous version failed its allclose check because the pure-JAX
# reference einsums ran at the TPU default (bf16) matmul precision while the
# kernel accumulated in f32.  Force full precision for the reference path.
jax.config.update("jax_default_matmul_precision", "highest")

_LN_EPS = 1e-5
_VMEM_LIMIT = 32 * 1024 * 1024  # raise v5e's 16 MiB default; <= v6e/v7x defaults


# ---------------------------------------------------------------------------
# Kernel 1: multi-head scaled dot-product attention (BasicAttn core)
# ---------------------------------------------------------------------------
def _softmax_rows(scores):
    m = jnp.max(scores, axis=-1, keepdims=True)
    e = jnp.exp(scores - m)
    denom = jnp.sum(e, axis=-1, keepdims=True)
    return e * pl.reciprocal(denom, approx=True)  # EUP slot; VPU stays free


def _mha_attn_kernel(q_ref, k_ref, v_ref, ctx_ref, attn_ref, *, sm_scale):
    q = q_ref[0]  # (H, S, Dk) -- keep input dtype; MXU accumulates in f32
    k = k_ref[0]  # (H, Sk, Dk)
    v = v_ref[0]  # (H, Sk, Dv)
    scores = jnp.einsum("hqd,hkd->hqk", q, k,
                        preferred_element_type=jnp.float32) * sm_scale
    attn = _softmax_rows(scores)
    ctx = jnp.einsum("hqk,hkd->hqd", attn.astype(v.dtype), v,
                     preferred_element_type=jnp.float32)
    ctx_ref[0] = ctx.astype(ctx_ref.dtype)
    attn_ref[0] = attn.astype(attn_ref.dtype)


def _mha_attn_kernel_masked(q_ref, k_ref, v_ref, m_ref, ctx_ref, attn_ref, *,
                            sm_scale):
    q = q_ref[0]
    k = k_ref[0]
    v = v_ref[0]
    mask = m_ref[0] != 0  # (H, S, Sk) int8 -> bool (True => masked out)
    scores = jnp.einsum("hqd,hkd->hqk", q, k,
                        preferred_element_type=jnp.float32) * sm_scale
    scores = jnp.where(mask, jnp.float32(-1e9), scores)  # masked_fill_(mask, -1e9)
    attn = _softmax_rows(scores)
    ctx = jnp.einsum("hqk,hkd->hqd", attn.astype(v.dtype), v,
                     preferred_element_type=jnp.float32)
    ctx_ref[0] = ctx.astype(ctx_ref.dtype)
    attn_ref[0] = attn.astype(attn_ref.dtype)


def basic_attn(Q, K, V, attn_mask, d_k):
    """Pallas BasicAttn.forward: returns (context, attn). Q,K,V: (B,H,S,D)."""
    B, H, S, Dk = Q.shape
    Sk = K.shape[2]
    Dv = V.shape[3]
    sm_scale = 1.0 / math.sqrt(d_k)

    q_spec = pl.BlockSpec((1, H, S, Dk), lambda b: (b, 0, 0, 0))
    k_spec = pl.BlockSpec((1, H, Sk, Dk), lambda b: (b, 0, 0, 0))
    v_spec = pl.BlockSpec((1, H, Sk, Dv), lambda b: (b, 0, 0, 0))
    ctx_spec = pl.BlockSpec((1, H, S, Dv), lambda b: (b, 0, 0, 0))
    attn_spec = pl.BlockSpec((1, H, S, Sk), lambda b: (b, 0, 0, 0))

    elem = Q.dtype.itemsize
    io_bytes = elem * B * H * (S * Dk + Sk * Dk + Sk * Dv + S * Dv) + 4 * B * H * S * Sk
    flops = 2 * B * H * S * Sk * (Dk + Dv)

    if attn_mask is None:
        kernel = functools.partial(_mha_attn_kernel, sm_scale=sm_scale)
        in_specs = [q_spec, k_spec, v_spec]
        operands = (Q, K, V)
    else:
        kernel = functools.partial(_mha_attn_kernel_masked, sm_scale=sm_scale)
        in_specs = [q_spec, k_spec, v_spec, attn_spec]
        operands = (Q, K, V, attn_mask.astype(jnp.int8))  # 4x smaller than int32
        io_bytes += B * H * S * Sk

    ctx, attn = pl.pallas_call(
        kernel,
        out_shape=(
            jax.ShapeDtypeStruct((B, H, S, Dv), Q.dtype),
            jax.ShapeDtypeStruct((B, H, S, Sk), jnp.float32),
        ),
        grid_spec=pltpu.PrefetchScalarGridSpec(
            num_scalar_prefetch=0,
            grid=(B,),
            in_specs=in_specs,
            out_specs=[ctx_spec, attn_spec],
        ),
        compiler_params=pltpu.CompilerParams(
            dimension_semantics=("parallel",),
            vmem_limit_bytes=_VMEM_LIMIT,
        ),
        cost_estimate=pl.CostEstimate(
            flops=int(flops),
            transcendentals=int(B * H * S * Sk),
            bytes_accessed=int(io_bytes),
        ),
    )(*operands)
    return ctx, attn


# ---------------------------------------------------------------------------
# Kernel 2: fused fc-projection + residual + LayerNorm + FFN + residual + LN
# ---------------------------------------------------------------------------
def _layer_norm(x, eps):
    mu = jnp.mean(x, axis=-1, keepdims=True)
    var = jnp.mean(jnp.square(x - mu), axis=-1, keepdims=True)
    return (x - mu) * jax.lax.rsqrt(var + eps)


def _layer_tail_kernel(ctx_ref, res_ref, fc_ref, w1_ref, b1_ref, w2_ref, b2_ref,
                       out_ref, *, eps):
    ctx = ctx_ref[0]                      # (S, H*Dv)
    res = res_ref[0].astype(jnp.float32)  # (S, d_model)
    # out = LayerNorm(fc(context) + enc_inputs)
    x = jnp.dot(ctx, fc_ref[...], preferred_element_type=jnp.float32) + res
    x = _layer_norm(x, eps)
    # out2 = LayerNorm(FFN(out) + out)
    h = jnp.dot(x.astype(ctx.dtype), w1_ref[...],
                preferred_element_type=jnp.float32) + b1_ref[...]
    h = jnp.maximum(h, 0.0)
    y = jnp.dot(h.astype(ctx.dtype), w2_ref[...],
                preferred_element_type=jnp.float32) + b2_ref[...]
    y = _layer_norm(y + x, eps)
    out_ref[0] = y.astype(out_ref.dtype)


def encoder_layer_tail(ctx_flat, residual, fc_w, w1, b1, w2, b2):
    B, S, d_model = residual.shape
    hdv = ctx_flat.shape[-1]
    d_ff = w1.shape[-1]
    b1_2d = b1.reshape(1, d_ff)
    b2_2d = b2.reshape(1, d_model)

    def full_spec(shape):
        return pl.BlockSpec(shape, lambda b, _n=len(shape): (0,) * _n)

    flops = 2 * B * S * (hdv * d_model + d_model * d_ff + d_ff * d_model)
    io_bytes = 4 * (B * S * (hdv + 2 * d_model) + hdv * d_model
                    + 2 * d_model * d_ff + d_ff + d_model)

    out = pl.pallas_call(
        functools.partial(_layer_tail_kernel, eps=_LN_EPS),
        out_shape=jax.ShapeDtypeStruct((B, S, d_model), residual.dtype),
        grid_spec=pltpu.PrefetchScalarGridSpec(
            num_scalar_prefetch=0,
            grid=(B,),
            in_specs=[
                pl.BlockSpec((1, S, hdv), lambda b: (b, 0, 0)),
                pl.BlockSpec((1, S, d_model), lambda b: (b, 0, 0)),
                full_spec((hdv, d_model)),
                full_spec((d_model, d_ff)),
                full_spec((1, d_ff)),
                full_spec((d_ff, d_model)),
                full_spec((1, d_model)),
            ],
            out_specs=pl.BlockSpec((1, S, d_model), lambda b: (b, 0, 0)),
        ),
        compiler_params=pltpu.CompilerParams(
            dimension_semantics=("parallel",),
            vmem_limit_bytes=_VMEM_LIMIT,
        ),
        cost_estimate=pl.CostEstimate(
            flops=int(flops),
            transcendentals=int(2 * B * S),
            bytes_accessed=int(io_bytes),
        ),
    )(ctx_flat, residual, fc_w, w1, b1_2d, w2, b2_2d)
    return out


# ---------------------------------------------------------------------------
# Encoder forward (wrapper)
# ---------------------------------------------------------------------------
def positional_encoding_table(d_hid, max_len=1000):
    pos = jnp.arange(max_len, dtype=jnp.float32)[:, None]
    div = jnp.power(10000.0, jnp.arange(0, d_hid, 2, dtype=jnp.float32) / d_hid)
    x = pos / div
    P = jnp.zeros((max_len, d_hid), jnp.float32)
    P = P.at[:, 0::2].set(jnp.sin(x))
    P = P.at[:, 1::2].set(jnp.cos(x))
    return P


def _split_heads(x, n_heads, d_head):
    B, S, _ = x.shape
    return x.reshape(B, S, n_heads, d_head).transpose(0, 2, 1, 3)


def encoder_layer_forward(x, p, n_heads, d_k, d_v):
    B, S, _ = x.shape
    q = _split_heads(x @ p["wq"], n_heads, d_k)
    k = _split_heads(x @ p["wk"], n_heads, d_k)
    v = _split_heads(x @ p["wv"], n_heads, d_v)
    ctx, attn = basic_attn(q, k, v, None, d_k)
    ctx_flat = ctx.transpose(0, 2, 1, 3).reshape(B, S, n_heads * d_v)
    out2 = encoder_layer_tail(ctx_flat, x, p["fc"], p["w1"], p["b1"],
                              p["w2"], p["b2"])
    return out2, attn


def encoder_forward(enc_input, layer_params, n_heads, d_k, d_v):
    B, S, d_model = enc_input.shape
    P = positional_encoding_table(d_model)
    x = enc_input + P[None, :S, :]
    attns = []
    for p in layer_params:
        x, attn = encoder_layer_forward(x, p, n_heads, d_k, d_v)
        attns.append(attn)
    return x, attns


# ---------------------------------------------------------------------------
# Pure-JAX reference (mirrors the PyTorch module semantics)
# ---------------------------------------------------------------------------
def _basic_attn_ref(Q, K, V, attn_mask, d_k):
    scores = jnp.einsum("bhqd,bhkd->bhqk", Q, K) / math.sqrt(d_k)
    if attn_mask is not None:
        scores = jnp.where(attn_mask.astype(bool), jnp.float32(-1e9), scores)
    attn = jax.nn.softmax(scores, axis=-1)
    ctx = jnp.einsum("bhqk,bhkd->bhqd", attn, V)
    return ctx, attn


def _layer_norm_ref(x, eps=_LN_EPS):
    mu = jnp.mean(x, axis=-1, keepdims=True)
    var = jnp.mean(jnp.square(x - mu), axis=-1, keepdims=True)
    return (x - mu) * jax.lax.rsqrt(var + eps)


def _encoder_forward_ref(enc_input, layer_params, n_heads, d_k, d_v):
    B, S, d_model = enc_input.shape
    P = positional_encoding_table(d_model)
    x = enc_input + P[None, :S, :]
    attns = []
    for p in layer_params:
        q = _split_heads(x @ p["wq"], n_heads, d_k)
        k = _split_heads(x @ p["wk"], n_heads, d_k)
        v = _split_heads(x @ p["wv"], n_heads, d_v)
        ctx, attn = _basic_attn_ref(q, k, v, None, d_k)
        ctx_flat = ctx.transpose(0, 2, 1, 3).reshape(B, S, n_heads * d_v)
        out = _layer_norm_ref(ctx_flat @ p["fc"] + x)
        ffn = jnp.maximum(out @ p["w1"] + p["b1"], 0.0) @ p["w2"] + p["b2"]
        x = _layer_norm_ref(ffn + out)
        attns.append(attn)
    return x, attns


if __name__ == "__main__":
    B, S = 2, 16
    d_model, d_ff = 32, 64
    n_heads, d_k, d_v = 4, 8, 8
    n_layers = 2

    root = jax.random.PRNGKey(0)
    root, k_in = jax.random.split(root)
    enc_input = jax.random.normal(k_in, (B, S, d_model), dtype=jnp.float32)

    layer_params = []
    for _ in range(n_layers):
        root, *ks = jax.random.split(root, 9)
        layer_params.append({
            "wq": jax.random.normal(ks[0], (d_model, n_heads * d_k), jnp.float32) / math.sqrt(d_model),
            "wk": jax.random.normal(ks[1], (d_model, n_heads * d_k), jnp.float32) / math.sqrt(d_model),
            "wv": jax.random.normal(ks[2], (d_model, n_heads * d_v), jnp.float32) / math.sqrt(d_model),
            "fc": jax.random.normal(ks[3], (n_heads * d_v, d_model), jnp.float32) / math.sqrt(n_heads * d_v),
            "w1": jax.random.normal(ks[4], (d_model, d_ff), jnp.float32) / math.sqrt(d_model),
            "b1": 0.1 * jax.random.normal(ks[5], (d_ff,), jnp.float32),
            "w2": jax.random.normal(ks[6], (d_ff, d_model), jnp.float32) / math.sqrt(d_ff),
            "b2": 0.1 * jax.random.normal(ks[7], (d_model,), jnp.float32),
        })

    # Full Encoder forward (Pallas attention + fused layer-tail kernels).
    out, attns = encoder_forward(enc_input, layer_params, n_heads, d_k, d_v)
    jax.block_until_ready((out, attns))

    out_ref, attns_ref = _encoder_forward_ref(enc_input, layer_params,
                                              n_heads, d_k, d_v)
    assert jnp.allclose(out, out_ref, atol=2e-2, rtol=2e-2), \
        float(jnp.max(jnp.abs(out - out_ref)))
    for a, ar in zip(attns, attns_ref):
        assert jnp.allclose(a, ar, atol=2e-2, rtol=2e-2), \
            float(jnp.max(jnp.abs(a - ar)))

    # Also exercise the masked BasicAttn kernel variant.
    root, kq, kk, kv, km = jax.random.split(root, 5)
    Qa = jax.random.normal(kq, (B, n_heads, S, d_k), dtype=jnp.float32)
    Ka = jax.random.normal(kk, (B, n_heads, S, d_k), dtype=jnp.float32)
    Va = jax.random.normal(kv, (B, n_heads, S, d_v), dtype=jnp.float32)
    mask = jax.random.bernoulli(km, p=0.3, shape=(B, n_heads, S, S))
    mask = mask & ~jnp.eye(S, dtype=bool)[None, None]
    ctx_m, attn_m = basic_attn(Qa, Ka, Va, mask, d_k)
    jax.block_until_ready((ctx_m, attn_m))
    ctx_r, attn_r = _basic_attn_ref(Qa, Ka, Va, mask, d_k)
    assert jnp.allclose(ctx_m, ctx_r, atol=2e-2, rtol=2e-2), \
        float(jnp.max(jnp.abs(ctx_m - ctx_r)))
    assert jnp.allclose(attn_m, attn_r, atol=2e-2, rtol=2e-2), \
        float(jnp.max(jnp.abs(attn_m - attn_r)))

    print("KERNEL_OK")
</pallas_src>

<mosaic_0001>
module attributes {stable_mosaic.version = 11 : i64} {
  func.func @_mha_attn_kernel(%arg0: i32, %arg1: memref<1x4x16x8xf32, #tpu.memory_space<vmem>>, %arg2: memref<1x4x16x8xf32, #tpu.memory_space<vmem>>, %arg3: memref<1x4x16x8xf32, #tpu.memory_space<vmem>>, %arg4: memref<1x4x16x8xf32, #tpu.memory_space<vmem>>, %arg5: memref<1x4x16x16xf32, #tpu.memory_space<vmem>>) attributes {dimension_semantics = [#tpu.dimension_semantics<parallel>], iteration_bounds = array<i64: 2>, scalar_prefetch = 0 : i64, scratch_operands = 0 : i64, tpu.core_type = #tpu.core_type<tc>, window_params = [{transform_indices = @transform_0, window_bounds = array<i64: 1, 4, 16, 8>}, {transform_indices = @transform_1, window_bounds = array<i64: 1, 4, 16, 8>}, {transform_indices = @transform_2, window_bounds = array<i64: 1, 4, 16, 8>}, {transform_indices = @transform_3, window_bounds = array<i64: 1, 4, 16, 8>}, {transform_indices = @transform_4, window_bounds = array<i64: 1, 4, 16, 16>}]} {
    %c0 = arith.constant 0 : index
    %c0_0 = arith.constant 0 : index
    %c0_1 = arith.constant 0 : index
    %c0_2 = arith.constant 0 : index
    %0 = vector.load %arg1[%c0, %c0_0, %c0_1, %c0_2] : memref<1x4x16x8xf32, #tpu.memory_space<vmem>>, vector<1x4x16x8xf32>
    %1 = vector.shape_cast %0 : vector<1x4x16x8xf32> to vector<4x16x8xf32>
    %c0_3 = arith.constant 0 : index
    %c0_4 = arith.constant 0 : index
    %c0_5 = arith.constant 0 : index
    %c0_6 = arith.constant 0 : index
    %2 = vector.load %arg2[%c0_3, %c0_4, %c0_5, %c0_6] : memref<1x4x16x8xf32, #tpu.memory_space<vmem>>, vector<1x4x16x8xf32>
    %3 = vector.shape_cast %2 : vector<1x4x16x8xf32> to vector<4x16x8xf32>
    %c0_7 = arith.constant 0 : index
    %c0_8 = arith.constant 0 : index
    %c0_9 = arith.constant 0 : index
    %c0_10 = arith.constant 0 : index
    %4 = vector.load %arg3[%c0_7, %c0_8, %c0_9, %c0_10] : memref<1x4x16x8xf32, #tpu.memory_space<vmem>>, vector<1x4x16x8xf32>
    %5 = vector.shape_cast %4 : vector<1x4x16x8xf32> to vector<4x16x8xf32>
    "tpu.trace_start"() <{level = 10 : i32, message = "hqd,hkd->hqk"}> : () -> ()
    %cst = arith.constant dense<0.000000e+00> : vector<4x16x16xf32>
    %6 = tpu.matmul %1, %3, %cst {dimension_numbers = #tpu.dot_dimension_numbers<[2], [2], [1], [1], [0, 0, 0, 1, 1, 1], [0], [0]>, precision = #tpu.contract_precision<fp32>} : vector<4x16x8xf32>, vector<4x16x8xf32>, vector<4x16x16xf32> -> vector<4x16x16xf32>
    "tpu.trace_stop"() : () -> ()
    %cst_11 = arith.constant 0.353553385 : f32
    %7 = vector.broadcast %cst_11 : f32 to vector<4x16x16xf32>
    %8 = arith.mulf %6, %7 : vector<4x16x16xf32>
    %cst_12 = arith.constant dense<0xFF800000> : vector<4x16xf32>
    %9 = vector.multi_reduction <maximumf>, %8, %cst_12 [2] : vector<4x16x16xf32> to vector<4x16xf32>
    %10 = vector.shape_cast %9 : vector<4x16xf32> to vector<4x16x1xf32>
    %11 = vector.broadcast %10 : vector<4x16x1xf32> to vector<4x16x16xf32>
    %12 = arith.subf %8, %11 : vector<4x16x16xf32>
    %13 = math.exp %12 : vector<4x16x16xf32>
    %cst_13 = arith.constant dense<0.000000e+00> : vector<4x16xf32>
    %14 = vector.multi_reduction <add>, %13, %cst_13 [2] : vector<4x16x16xf32> to vector<4x16xf32>
    %15 = vector.shape_cast %14 : vector<4x16xf32> to vector<4x16x1xf32>
    %16 = tpu.reciprocal %15 {approx = true} : vector<4x16x1xf32> -> vector<4x16x1xf32>
    %17 = vector.broadcast %16 : vector<4x16x1xf32> to vector<4x16x16xf32>
    %18 = arith.mulf %13, %17 : vector<4x16x16xf32>
    "tpu.trace_start"() <{level = 10 : i32, message = "hqk,hkd->hqd"}> : () -> ()
    %cst_14 = arith.constant dense<0.000000e+00> : vector<4x16x8xf32>
    %19 = tpu.matmul %18, %5, %cst_14 {dimension_numbers = #tpu.dot_dimension_numbers<[2], [1], [1], [2], [0, 0, 0, 1, 1, 2], [0], [0]>, precision = #tpu.contract_precision<fp32>} : vector<4x16x16xf32>, vector<4x16x8xf32>, vector<4x16x8xf32> -> vector<4x16x8xf32>
    "tpu.trace_stop"() : () -> ()
    %c0_15 = arith.constant 0 : index
    %c0_16 = arith.constant 0 : index
    %c0_17 = arith.constant 0 : index
    %c0_18 = arith.constant 0 : index
    %20 = vector.load %arg4[%c0_15, %c0_16, %c0_17, %c0_18] : memref<1x4x16x8xf32, #tpu.memory_space<vmem>>, vector<1x4x16x8xf32>
    %21 = vector.shape_cast %20 : vector<1x4x16x8xf32> to vector<4x16x8xf32>
    %22 = vector.shape_cast %19 : vector<4x16x8xf32> to vector<1x4x16x8xf32>
    tpu.vector_store %arg4[%c0_15, %c0_16, %c0_17, %c0_18], %22 {strides = array<i32>} : memref<1x4x16x8xf32, #tpu.memory_space<vmem>>, vector<1x4x16x8xf32>,
    %c0_19 = arith.constant 0 : index
    %c0_20 = arith.constant 0 : index
    %c0_21 = arith.constant 0 : index
    %c0_22 = arith.constant 0 : index
    %23 = vector.load %arg5[%c0_19, %c0_20, %c0_21, %c0_22] : memref<1x4x16x16xf32, #tpu.memory_space<vmem>>, vector<1x4x16x16xf32>
    %24 = vector.shape_cast %23 : vector<1x4x16x16xf32> to vector<4x16x16xf32>
    %25 = vector.shape_cast %18 : vector<4x16x16xf32> to vector<1x4x16x16xf32>
    tpu.vector_store %arg5[%c0_19, %c0_20, %c0_21, %c0_22], %25 {strides = array<i32>} : memref<1x4x16x16xf32, #tpu.memory_space<vmem>>, vector<1x4x16x16xf32>,
    return
  }
  func.func @transform_0(%arg0: i32) -> (i32, i32, i32, i32) {
    %c0_i32 = arith.constant 0 : i32
    %c0_i32_0 = arith.constant 0 : i32
    %c0_i32_1 = arith.constant 0 : i32
    %c0_i32_2 = arith.constant 0 : i32
    return %arg0, %c0_i32, %c0_i32_0, %c0_i32_1 : i32, i32, i32, i32
  }
  func.func @transform_1(%arg0: i32) -> (i32, i32, i32, i32) {
    %c0_i32 = arith.constant 0 : i32
    %c0_i32_0 = arith.constant 0 : i32
    %c0_i32_1 = arith.constant 0 : i32
    %c0_i32_2 = arith.constant 0 : i32
    return %arg0, %c0_i32, %c0_i32_0, %c0_i32_1 : i32, i32, i32, i32
  }
  func.func @transform_2(%arg0: i32) -> (i32, i32, i32, i32) {
    %c0_i32 = arith.constant 0 : i32
    %c0_i32_0 = arith.constant 0 : i32
    %c0_i32_1 = arith.constant 0 : i32
    %c0_i32_2 = arith.constant 0 : i32
    return %arg0, %c0_i32, %c0_i32_0, %c0_i32_1 : i32, i32, i32, i32
  }
  func.func @transform_3(%arg0: i32) -> (i32, i32, i32, i32) {
    %c0_i32 = arith.constant 0 : i32
    %c0_i32_0 = arith.constant 0 : i32
    %c0_i32_1 = arith.constant 0 : i32
    %c0_i32_2 = arith.constant 0 : i32
    return %arg0, %c0_i32, %c0_i32_0, %c0_i32_1 : i32, i32, i32, i32
  }
  func.func @transform_4(%arg0: i32) -> (i32, i32, i32, i32) {
    %c0_i32 = arith.constant 0 : i32
    %c0_i32_0 = arith.constant 0 : i32
    %c0_i32_1 = arith.constant 0 : i32
    %c0_i32_2 = arith.constant 0 : i32
    return %arg0, %c0_i32, %c0_i32_0, %c0_i32_1 : i32, i32, i32, i32
  }
}

</mosaic_0001>

<bundles_post_ra>
// kernel: tpu_custom_call.1
= control target key start
LH: loop header
LB: loop body
LE: loop exit
PB: predicated region body
PF: predicated region fallthrough
CT: control target
= control target key end

     0   :  { %10 = vsyncpa [#allocation3], 0  ;;  %s2671_s0 = inlined_call_operand.vmem [shape: f32[2,4,16,8], index: 0, kind: input, shape index: {}]   ;;  %s2672_s1 = inlined_call_operand.vmem [shape: f32[2,4,16,8], index: 1, kind: input, shape index: {}]   ;;  %s2673_s2 = inlined_call_operand.vmem [shape: f32[2,4,16,8], index: 2, kind: input, shape index: {}]   ;;  %s2674_s3 = inlined_call_operand.vmem [shape: f32[2,4,16,8], index: 3, kind: output, shape index: {0}]   ;;  %s2675_s4 = inlined_call_operand.hbm [shape: f32[2,4,16,16], index: 4, kind: output, shape index: {1}]  }
   0x1   :  { %12 = vsyncpa [#allocation3 + $0x1], 0  ;;  %s2301_s15 = smov 0   ;;  %s2303_s16 = smov 0  }
   0x2   :  { %s2305_s17 = smov 0   ;;  %s2307_s18 = smov 0  }
   0x3 LB: > { %s2322_s19 = sadd.s32 4294967295, %s2272_s18   ;;  %s2114_s20 = sadd.s32 4294967294, %s2272_s18   ;;  %s2272_s18 = sphi %s2307_s18, %s2681_s18   ;;  %s2268_s17 = sphi %s2305_s17, %s2680_s17   ;;  %s2264_s16 = sphi %s2303_s16, %s2679_s16   ;;  %s2260_s15 = sphi %s2301_s15, %s2678_s15  }
   0x4   : > { %s2326_s21 = sadd.s32 1, %s2272_s18   ;;  %s129_s22 = sadd.s32 1, %s2268_s17 }
   0x5   : > { %s126_s23 = ssub.s32 %s2272_s18, %s2326_s21  ;;  %p139_p0 = scmp.ne.s32.totalorder %s2268_s17, %s2264_s16 }
   0x6   : > { %p127_p1 = scmp.eq.s32.totalorder %s126_s23, 0  ;;  %p140_p2 = scmp.eq.s32.totalorder %s2322_s19, 1 }
   0x7   : > { %p145_p3 = scmp.ne.s32.totalorder %s2264_s16, %s2260_s15  ;;  %p146_p4 = scmp.eq.s32.totalorder %s2114_s20, 1 }
   0x8   : > { %s2337_s24 = scalar_select %p127_p1, %s2268_s17, %s129_s22  }
   0x9   : > { %p2339_p5 = por %p140_p2, %p139_p0  ;;  %p2343_p6 = por %p146_p4, %p145_p3 }
   0xa   : > { %p2117_p7 = scmp.ge.s32.totalorder %s2272_s18, 1  ;;  %p188_p8 = scmp.lt.s32.totalorder %s2272_s18, 3 }
   0xc   : > { %p189_p9 = pnand %p2117_p7, %p188_p8 }
   0xd   : > { %p229_p10 = scmp.lt.s32.totalorder (!%p189_p9), %s2322_s19, 1  ;;  %s226_s12 = sand.u32 (!%p189_p9), 1, %s2264_s16  }
   0xe   : > { %192 = sbr.rel (%p189_p9) target bundleno = 750 (0x2ee), region = 32  ;;  %s2118_s13 = sshll.u32 (!%p189_p9), %s226_s12, 6 }
   0xf   : > { %s2535_s14 = scalar_lea.vmem (!%p189_p9), [#allocation2], %s2118_s13  ;;  %s1985_s7 = scalar_lea.sflag (!%p189_p9), [#allocation3], %s226_s12 }
  0x13   : > { %s230_s27 = scalar_select %p229_p10, %s2322_s19, 1  ;;  %vm273_vm0 = vcmask 64512   ;;  %vm1090_vm1 = vcmask 130048  }
  0x15   : > { %s2351_s28 = sshll.u32 %s230_s27, 6  ;;  %s2136_s27 = sshll.u32 %s2322_s19, 6 }
  0x16   : > { %s2357_s5 = scalar_lea.vmem %s2672_s1, %s2351_s28  ;;  %s2363_s8 = scalar_lea.vmem %s2671_s0, %s2351_s28 }
  0x17   : > { %v258_v0 = vld [vmem:[%s2357_s5 + $0x8] sm:$0xff]  ;;  %v257_v1 = vld [vmem:[%s2357_s5] sm:$0xff]  ;;  %v260_v7 = vld [vmem:[%s2357_s5 + $0x18] sm:$0xff]  ;;  %s2516_s11 = scalar_lea.vmem %s2673_s2, %s2351_s28  ;;  %s2619_s23 = scalar_lea.vmem %s2674_s3, %s2351_s28 }
  0x18   : > { %v249_v2 = vld [vmem:[%s2363_s8] sm:$0xff]  ;;  %v284_v3 = vsel %vm273_vm0, %v258_v0, 0  ;;  %v281_v4 = vsel %vm273_vm0, %v257_v1, 0  ;;  %v250_v6 = vld [vmem:[%s2363_s8 + $0x8] sm:$0xff]  ;;  %v259_v8 = vld [vmem:[%s2357_s5 + $0x10] sm:$0xff]  ;;  %v486_v15 = vsel %vm273_vm0, %v260_v7, 0  ;;  %s1999_s30 = scalar_lea.hbm %s2675_s4, %s2136_s27 }
  0x19   : > { %v275_v5 = vsel %vm273_vm0, %v249_v2, 0  ;;  %v300_v9 = vand.u32 4294901760, %v284_v3  ;;  %v2374_v10 = vand.u32 4294901760, %v281_v4  ;;  %v278_v12 = vsel %vm273_vm0, %v250_v6, 0  ;;  %v251_v13 = vld [vmem:[%s2363_s8 + $0x10] sm:$0xff]  ;;  %v252_v40 = vld [vmem:[%s2363_s8 + $0x18] sm:$0xff] }
  0x1a   : > { %v2376_v11 = vand.u32 4294901760, %v275_v5  ;;  %v2380_v14 = vand.u32 4294901760, %v278_v12  ;;  %v483_v16 = vsel %vm273_vm0, %v259_v8, 0  ;;  %v2386_v20 = vand.u32 4294901760, %v486_v15  ;;  %v262_v48 = vld [vmem:[%s2357_s5 + $0x28] sm:$0xff]  ;;  %v261_v54 = vld [vmem:[%s2357_s5 + $0x20] sm:$0xff] }
  0x1b   : > { %301 = vmatpush.xpose.msra.mxu0 %v300_v9  ;;  %v336_v17 = vsub.f32 %v284_v3, %v300_v9  ;;  %402 = vmatpush.xpose.msra.mxu3 %v300_v9  ;;  %v342_v19 = vsub.f32 %v281_v4, %v2374_v10  ;;  %v2389_v22 = vand.u32 4294901760, %v483_v16  ;;  %v477_v23 = vsel %vm273_vm0, %v251_v13, 0  ;;  %s2002_s6 = sshll.u32 %s1999_s30, 4  ;;  %s2003_s6 = int_to_ptr.hbm [resolvable:$true] %s2002_s6 }
  0x1c   : > { %v305_v18 = vsub.f32 %v275_v5, %v2376_v11  ;;  %v313_v21 = vsub.f32 %v278_v12, %v2380_v14  ;;  %v538_v27 = vsub.f32 %v486_v15, %v2386_v20  ;;  %v2396_v35 = vand.u32 4294901760, %v477_v23  ;;  %v253_v5 = vld [vmem:[%s2363_s8 + $0x20] sm:$0xff] }
  0x1d   : > { %372 = vmatpush.xpose.msra.mxu2 %v336_v17  ;;  %v337_v25 = vand.u32 4294901760, %v336_v17  ;;  %v343_v26 = vand.u32 4294901760, %v342_v19  ;;  %v544_v29 = vsub.f32 %v483_v16, %v2389_v22  ;;  %v480_v46 = vsel %vm273_vm0, %v252_v40, 0  ;;  %v256_v40 = vld [vmem:[%s2363_s8 + $0x38] sm:$0xff] }
  0x1e   : > { %v306_v24 = vand.u32 4294901760, %v305_v18  ;;  %v314_v28 = vand.u32 4294901760, %v313_v21  ;;  %v539_v33 = vand.u32 4294901760, %v538_v27  ;;  %v2401_v44 = vsub.f32 %v477_v23, %v2396_v35 }
  0x1f   : > { %303 = vmatpush.xpose.msra.mxu0 %v2374_v10  ;;  %v338_v31 = vsub.f32 %v336_v17, %v337_v25  ;;  %404 = vmatpush.xpose.msra.mxu3 %v2374_v10  ;;  %v344_v32 = vsub.f32 %v342_v19, %v343_v26  ;;  %v545_v34 = vand.u32 4294901760, %v544_v29  ;;  %v2407_v50 = vand.u32 4294901760, %v480_v46 }
  0x20   : > { %v307_v30 = vsub.f32 %v305_v18, %v306_v24  ;;  %v540_v38 = vsub.f32 %v538_v27, %v539_v33  ;;  %v315_v42 = vsub.f32 %v313_v21, %v314_v28  ;;  %v508_v49 = vand.u32 4294901760, %v2401_v44 }
  0x21   : > { %v339_v37 = vand.u32 4294901760, %v338_v31  ;;  %375 = vmatpush.xpose.msra.mxu2 %v342_v19  ;;  %v546_v39 = vsub.f32 %v544_v29, %v545_v34  ;;  %v345_v41 = vand.u32 4294901760, %v344_v32  ;;  %v688_v51 = vsel %vm273_vm0, %v262_v48, 0  ;;  %v263_v19 = vld [vmem:[%s2357_s5 + $0x30] sm:$0xff] }
  0x22   : > { %v308_v36 = vand.u32 4294901760, %v307_v30  ;;  %408 = vmatmul.f32.vlgmr.msra.gmra.mxu3 %v306_v24  ;;  %v541_v43 = vand.u32 4294901760, %v540_v38  ;;  %v316_v47 = vand.u32 4294901760, %v315_v42  ;;  %v2410_v52 = vand.u32 4294901760, %v688_v51 }
  0x23   : > { %435 = vmatpush.xpose.msrb.mxu0 %v337_v25  ;;  %340 = vmatpush.xpose.msra.mxu1 %v339_v37  ;;  %v547_v45 = vand.u32 4294901760, %v546_v39  ;;  %v509_v55 = vsub.f32 %v2401_v44, %v508_v49  ;;  %v515_v56 = vsub.f32 %v480_v46, %v2407_v50  ;;  %v685_v57 = vsel %vm273_vm0, %v261_v54, 0 }
  0x24   : > { %309 = vmatmul.f32.vlgmr.msra.gmra.mxu0 %v308_v36  ;;  %378 = vmatmul.f32.vlgmr.msra.gmra.mxu2 %v305_v18  ;;  %v740_v53 = vsub.f32 %v688_v51, %v2410_v52  ;;  %v706_v58 = vand.u32 4294901760, %v685_v57  ;;  %v679_v7 = vsel %vm273_vm0, %v253_v5, 0  ;;  %v264_v18 = vld [vmem:[%s2357_s5 + $0x38] sm:$0xff]  ;;  %s2000_s5 = sshll.u32 %s2535_s14, 4  ;;  %s2001_s5 = int_to_ptr.vmem [resolvable:$true] %s2000_s5 }
  0x25   : > { %503 = vmatpush.xpose.msrb.mxu2 %v2386_v20  ;;  %542 = vmatpush.xpose.msrb.mxu3 %v541_v43  ;;  %v510_v61 = vand.u32 4294901760, %v509_v55  ;;  %v516_v62 = vand.u32 4294901760, %v515_v56  ;;  %v708_v8 = vand.u32 4294901760, %v679_v7 }
  0x26   : > { %v741_v59 = vand.u32 4294901760, %v740_v53  ;;  %v746_v60 = vsub.f32 %v685_v57, %v706_v58 }
  0x27   : > { %439 = vmatpush.xpose.msrb.mxu0 %v343_v26  ;;  %346 = vmatpush.xpose.msra.mxu1 %v345_v41  ;;  %v517_v1 = vsub.f32 %v515_v56, %v516_v62  ;;  %v884_v41 = vsel %vm273_vm0, %v256_v40, 0 }
  0x28   : > { %v742_v63 = vsub.f32 %v740_v53, %v741_v59  ;;  %v747_v0 = vand.u32 4294901760, %v746_v60  ;;  %v918_v43 = vand.u32 4294901760, %v884_v41 }
  0x29   : > { %505 = vmatpush.xpose.msrb.mxu2 %v2389_v22  ;;  %548 = vmatpush.xpose.msrb.mxu3 %v547_v45  ;;  %v518_v4 = vand.u32 4294901760, %v517_v1 }
  0x2a   : > { %348 = vmatmul.f32.vlgmr.msra.gmra.mxu1 %v2376_v11  ;;  %414 = vmatmul.f32.gmra.mxu3 %v314_v28  ;;  %v743_v2 = vand.u32 4294901760, %v742_v63  ;;  %v748_v3 = vsub.f32 %v746_v60, %v747_v0 }
  0x2b   : > { %574 = vmatpush.xpose.msra.mxu0 %v538_v27  ;;  %464 = vmatpush.xpose.msrb.mxu1 %v300_v9  ;;  %v254_v9 = vld [vmem:[%s2363_s8 + $0x28] sm:$0xff] }
  0x2c   : > { %317 = vmatmul.f32.gmra.mxu0 %v316_v47  ;;  %383 = vmatmul.f32.gmra.mxu2 %v313_v21  ;;  %v749_v6 = vand.u32 4294901760, %v748_v3  ;;  %v890_v21 = vsel %vm273_vm0, %v264_v18, 0 }
  0x2d   : > { %637 = vmatpush.xpose.msra.mxu2 %v539_v33  ;;  %666 = vmatpush.xpose.msra.mxu3 %v2386_v20  ;;  %v906_v23 = vand.u32 4294901760, %v890_v21 }
  0x2f   : > { %577 = vmatpush.xpose.msra.mxu0 %v544_v29  ;;  %466 = vmatpush.xpose.msrb.mxu1 %v2374_v10  ;;  %v709_v10 = vsub.f32 %v679_v7, %v708_v8  ;;  %v942_v25 = vsub.f32 %v890_v21, %v906_v23 }
  0x31   : > { %641 = vmatpush.xpose.msra.mxu2 %v545_v34  ;;  %668 = vmatpush.xpose.msra.mxu3 %v2389_v22  ;;  %v710_v12 = vand.u32 4294901760, %v709_v10  ;;  %v943_v28 = vand.u32 4294901760, %v942_v25  ;;  %v255_v34 = vld [vmem:[%s2363_s8 + $0x30] sm:$0xff]  ;;  %s2224_s8 = sshra.s32 %s2003_s6, 4  ;;  %s2225_s8 = int_to_ptr.hbm [resolvable:$true] %s2224_s8 }
  0x32   : > { %352 = vmatmul.f32.gmra.mxu1 %v2380_v14  ;;  %550 = vmatmul.f32.vlgmr.msrb.gmra.mxu3 %v2396_v35  ;;  %s2226_s9 = scalar_lea.hbm %s2225_s8, 64  ;;  %p2231_p0 = scmp.lt.s32.totalorder %s2225_s8, %s2675_s4 }
  0x33   : > { %604 = vmatpush.xpose.msra.mxu1 %v2386_v20  ;;  %v944_v30 = vsub.f32 %v942_v25, %v943_v28  ;;  %p2227_p11 = scmp.ne.s32.totalorder %s2225_s8, %s2226_s9 }
  0x34   : > { %441 = vmatmul.f32.vlgmr.msrb.gmra.mxu0 %v2376_v11  ;;  %511 = vmatmul.f32.vlgmr.msrb.gmra.mxu2 %v510_v61 }
  0x35   : > { %806 = vmatpush.xpose.msrb.mxu3 %v2410_v52  ;;  %705 = vmatpush.xpose.msrb.mxu0 %v2410_v52  ;;  %v945_v32 = vand.u32 4294901760, %v944_v30  ;;  %p2228_p12 = pnand %p2227_p11, %p2339_p5 }
  0x36   : > { %776 = vmatpush.xpose.msrb.mxu2 %v740_v53 }
  0x37   : > { %606 = vmatpush.xpose.msra.mxu1 %v2389_v22  ;;  %v887_v22 = vsel %vm273_vm0, %v263_v19, 0  ;;  %p2229_p13 = pneg %p2228_p12 }
  0x38   : > { %v908_v24 = vand.u32 4294901760, %v887_v22 }
  0x39   : > { %808 = vmatpush.xpose.msrb.mxu3 %v706_v58  ;;  %707 = vmatpush.xpose.msrb.mxu0 %v706_v58 }
  0x3a   : > { %779 = vmatpush.xpose.msrb.mxu2 %v746_v60  ;;  %468 = vmatmul.f32.vlgmr.msrb.gmra.mxu1 %v2376_v11  ;;  %v682_v11 = vsel %vm273_vm0, %v254_v9, 0  ;;  %v948_v26 = vsub.f32 %v887_v22, %v908_v24 }
  0x3b   : > { %554 = vmatmul.f32.gmra.mxu3 %v2407_v50  ;;  %744 = vmatpush.xpose.msrb.mxu1 %v743_v2  ;;  %v716_v13 = vand.u32 4294901760, %v682_v11 }
  0x3c   : > { %445 = vmatmul.f32.gmra.mxu0 %v2380_v14  ;;  %519 = vmatmul.f32.gmra.mxu2 %v518_v4  ;;  %v949_v29 = vand.u32 4294901760, %v948_v26 }
  0x3d   : > { %v717_v15 = vsub.f32 %v682_v11, %v716_v13 }
  0x3e   : > { %v950_v31 = vsub.f32 %v948_v26, %v949_v29 }
  0x3f   : > { %750 = vmatpush.xpose.msrb.mxu1 %v749_v6  ;;  %v718_v17 = vand.u32 4294901760, %v717_v15 }
  0x40   : > { %v951_v33 = vand.u32 4294901760, %v950_v31 }
  0x41   : > { %v719_v20 = vsub.f32 %v717_v15, %v718_v17 }
  0x42   : > { %472 = vmatmul.f32.gmra.mxu1 %v2380_v14  ;;  %v711_v14 = vsub.f32 %v709_v10, %v710_v12 }
  0x43   : > { %670 = vmatmul.f32.vlgmr.msra.gmra.mxu3 %v2396_v35  ;;  %v720_v27 = vand.u32 4294901760, %v719_v20 }
  0x44   : > { %580 = vmatmul.f32.vlgmr.msra.gmra.mxu0 %v2401_v44  ;;  %643 = vmatmul.f32.vlgmr.msra.gmra.mxu2 %v2396_v35  ;;  %v712_v16 = vand.u32 4294901760, %v711_v14  ;;  %v881_v35 = vsel %vm273_vm0, %v255_v34, 0  ;;  %v919_v44 = vsub.f32 %v884_v41, %v918_v43 }
  0x45   : > { %839 = vmatpush.xpose.msra.mxu0 %v741_v59  ;;  %907 = vmatpush.xpose.msra.mxu2 %v906_v23  ;;  %v910_v36 = vand.u32 4294901760, %v881_v35 }
  0x46   : > { %946 = vmatpush.xpose.msra.mxu3 %v945_v32  ;;  %v920_v45 = vand.u32 4294901760, %v919_v44 }
  0x47   : > { %v911_v37 = vsub.f32 %v881_v35, %v910_v36 }
  0x48   : > { %v921_v46 = vsub.f32 %v919_v44, %v920_v45 }
  0x49   : > { %843 = vmatpush.xpose.msra.mxu0 %v747_v0  ;;  %909 = vmatpush.xpose.msra.mxu2 %v908_v24  ;;  %v912_v38 = vand.u32 4294901760, %v911_v37 }
  0x4a   : > { %610 = vmatmul.f32.vlgmr.msra.gmra.mxu1 %v508_v49  ;;  %952 = vmatpush.xpose.msra.mxu3 %v951_v33  ;;  %v922_v47 = vand.u32 4294901760, %v921_v46 }
  0x4b   : > { %674 = vmatmul.f32.gmra.mxu3 %v2407_v50  ;;  %868 = vmatpush.xpose.msra.mxu1 %v2410_v52  ;;  %v913_v39 = vsub.f32 %v911_v37, %v912_v38 }
  0x4c   : > { %585 = vmatmul.f32.gmra.mxu0 %v515_v56  ;;  %647 = vmatmul.f32.gmra.mxu2 %v2407_v50 }
  0x4d   : > { %v914_v42 = vand.u32 4294901760, %v913_v39 }
  0x4f   : > { %870 = vmatpush.xpose.msra.mxu1 %v706_v58 }
  0x52   : > { %616 = vmatmul.f32.gmra.mxu1 %v516_v62 }
  0x53   : > { %812 = vmatmul.f32.vlgmr.msrb.gmra.mxu3 %v710_v12 }
  0x54   : > { %713 = vmatmul.f32.vlgmr.msrb.gmra.mxu0 %v712_v16  ;;  %782 = vmatmul.f32.vlgmr.msrb.gmra.mxu2 %v709_v10 }
  0x55   : > { %978 = vmatpush.xpose.msrb.mxu0 %v942_v25  ;;  %1041 = vmatpush.xpose.msrb.mxu2 %v943_v28 }
  0x56   : > { %1070 = vmatpush.xpose.msrb.mxu3 %v906_v23 }
  0x59   : > { %981 = vmatpush.xpose.msrb.mxu0 %v948_v26  ;;  %1045 = vmatpush.xpose.msrb.mxu2 %v949_v29 }
  0x5a   : > { %752 = vmatmul.f32.vlgmr.msrb.gmra.mxu1 %v708_v8  ;;  %1072 = vmatpush.xpose.msrb.mxu3 %v908_v24 }
  0x5b   : > { %818 = vmatmul.f32.gmra.mxu3 %v718_v17  ;;  %1008 = vmatpush.xpose.msrb.mxu1 %v906_v23 }
  0x5c   : > { %721 = vmatmul.f32.gmra.mxu0 %v720_v27  ;;  %787 = vmatmul.f32.gmra.mxu2 %v717_v15 }
  0x5f   : > { %1010 = vmatpush.xpose.msrb.mxu1 %v908_v24 }
  0x62   : > { %756 = vmatmul.f32.gmra.mxu1 %v716_v13 }
  0x63   : > { %954 = vmatmul.f32.vlgmr.msra.gmra.mxu3 %v910_v36 }
  0x64   : > { %845 = vmatmul.f32.vlgmr.msra.gmra.mxu0 %v708_v8  ;;  %915 = vmatmul.f32.vlgmr.msra.gmra.mxu2 %v914_v42 }
  0x6a   : > { %872 = vmatmul.f32.vlgmr.msra.gmra.mxu1 %v708_v8 }
  0x6b   : > { %958 = vmatmul.f32.gmra.mxu3 %v918_v43 }
  0x6c   : > { %849 = vmatmul.f32.gmra.mxu0 %v716_v13  ;;  %923 = vmatmul.f32.gmra.mxu2 %v922_v47 }
  0x72   : > { %876 = vmatmul.f32.gmra.mxu1 %v716_v13 }
  0x73   : > { %1074 = vmatmul.f32.vlgmr.msrb.gmra.mxu3 %v910_v36 }
  0x74   : > { %984 = vmatmul.f32.vlgmr.msrb.gmra.mxu0 %v911_v37  ;;  %1047 = vmatmul.f32.vlgmr.msrb.gmra.mxu2 %v910_v36 }
  0x7a   : > { %1014 = vmatmul.f32.vlgmr.msrb.gmra.mxu1 %v912_v38 }
  0x7b   : > { %1078 = vmatmul.f32.gmra.mxu3 %v918_v43 }
  0x7c   : > { %989 = vmatmul.f32.gmra.mxu0 %v919_v44  ;;  %1051 = vmatmul.f32.gmra.mxu2 %v918_v43 }
  0x82   : > { %1020 = vmatmul.f32.gmra.mxu1 %v920_v45 }
  0xa1   : > { %v310_v48 = vpop.f32.mrf.mxu0 }
  0xa5   : > { %v409_v49 = vpop.f32.mrf.mxu3 }
  0xa7   : > { %v349_v50 = vpop.f32.mrf.mxu1  ;;  %v379_v51 = vpop.f32.mrf.mxu2 }
  0xa8   : > { %v350_v53 = vadd.f32 %v349_v50, %v310_v48 }
  0xa9   : > { %v318_v52 = vpop.f32.mrf.mxu0 }
  0xaa   : > { %v380_v57 = vadd.f32 %v379_v51, %v350_v53 }
  0xac   : > { %v410_v59 = vadd.f32 %v409_v49, %v380_v57 }
  0xad   : > { %v415_v54 = vpop.f32.mrf.mxu3 }
  0xaf   : > { %v353_v55 = vpop.f32.mrf.mxu1  ;;  %v384_v56 = vpop.f32.mrf.mxu2 }
  0xb0   : > { %v354_v60 = vadd.f32 %v353_v55, %v318_v52 }
  0xb1   : > { %v442_v58 = vpop.f32.mrf.mxu0 }
  0xb2   : > { %v443_v62 = vadd.f32 %v442_v58, %v410_v59  ;;  %v385_v1 = vadd.f32 %v384_v56, %v354_v60 }
  0xb4   : > { %v416_v5 = vadd.f32 %v415_v54, %v385_v1 }
  0xb5   : > { %v551_v61 = vpop.f32.mrf.mxu3 }
  0xb7   : > { %v469_v63 = vpop.f32.mrf.mxu1  ;;  %v512_v0 = vpop.f32.mrf.mxu2 }
  0xb8   : > { %v470_v2 = vadd.f32 %v469_v63, %v443_v62  ;;  %v552_v11 = vadd.f32 %v551_v61, %v512_v0 }
  0xb9   : > { %v446_v3 = vpop.f32.mrf.mxu0 }
  0xba   : > { %v2450_v4 = vmul.f32 0.35355338, %v470_v2  ;;  %v447_v8 = vadd.f32 %v446_v3, %v416_v5 }
  0xbc   : > { %v1091_v6 = vsel %vm1090_vm1, %v2450_v4, -inf }
  0xbd   : > { %1092 = vmax.xlane.f32.xlu0 %v1091_v6 }
  0xbe   : > { %v555_v7 = vpop.f32.mrf.mxu3 }
  0xbf   : > { %v473_v9 = vpop.f32.mrf.mxu1  ;;  %v520_v10 = vpop.f32.mrf.mxu2 }
  0xc0   : > { %v474_v12 = vadd.f32 %v473_v9, %v447_v8  ;;  %v556_v20 = vadd.f32 %v555_v7, %v520_v10 }
  0xc1   : > { %v581_v13 = vpop.f32.mrf.mxu0 }
  0xc2   : > { %v2454_v14 = vmul.f32 0.35355338, %v474_v12  ;;  %v582_v15 = vadd.f32 %v581_v13, %v552_v11 }
  0xc4   : > { %v1094_v16 = vsel %vm1090_vm1, %v2454_v14, -inf }
  0xc5   : > { %1095 = vmax.xlane.f32.xlu0 %v1094_v16 }
  0xc6   : > { %v671_v17 = vpop.f32.mrf.mxu3 }
  0xc7   : > { %v611_v18 = vpop.f32.mrf.mxu1  ;;  %v644_v19 = vpop.f32.mrf.mxu2 }
  0xc8   : > { %v612_v21 = vadd.f32 %v611_v18, %v582_v15 }
  0xc9   : > { %v586_v22 = vpop.f32.mrf.mxu0 }
  0xca   : > { %v645_v23 = vadd.f32 %v644_v19, %v612_v21  ;;  %v587_v25 = vadd.f32 %v586_v22, %v556_v20 }
  0xcc   : > { %v672_v24 = vadd.f32 %v671_v17, %v645_v23 }
  0xce   : > { %v2458_v26 = vmul.f32 0.35355338, %v672_v24  ;;  %v675_v32 = vpop.f32.mrf.mxu3 }
  0xcf   : > { %v617_v27 = vpop.f32.mrf.mxu1  ;;  %v648_v28 = vpop.f32.mrf.mxu2 }
  0xd0   : > { %v618_v29 = vadd.f32 %v617_v27, %v587_v25  ;;  %v1097_v30 = vsel %vm1090_vm1, %v2458_v26, -inf }
  0xd1   : > { %v714_v31 = vpop.f32.mrf.mxu0  ;;  %1098 = vmax.xlane.f32.xlu1 %v1097_v30 }
  0xd2   : > { %v649_v33 = vadd.f32 %v648_v28, %v618_v29 }
  0xd4   : > { %v676_v34 = vadd.f32 %v675_v32, %v649_v33 }
  0xd6   : > { %v2462_v35 = vmul.f32 0.35355338, %v676_v34  ;;  %v813_v41 = vpop.f32.mrf.mxu3 }
  0xd7   : > { %v753_v36 = vpop.f32.mrf.mxu1  ;;  %v783_v37 = vpop.f32.mrf.mxu2 }
  0xd8   : > { %v754_v38 = vadd.f32 %v753_v36, %v714_v31  ;;  %v1100_v39 = vsel %vm1090_vm1, %v2462_v35, -inf }
  0xd9   : > { %v722_v40 = vpop.f32.mrf.mxu0  ;;  %1101 = vmax.xlane.f32.xlu1 %v1100_v39 }
  0xda   : > { %v784_v42 = vadd.f32 %v783_v37, %v754_v38 }
  0xdc   : > { %v814_v45 = vadd.f32 %v813_v41, %v784_v42 }
  0xde   : > { %v819_v50 = vpop.f32.mrf.mxu3 }
  0xdf   : > { %v757_v43 = vpop.f32.mrf.mxu1  ;;  %v788_v47 = vpop.f32.mrf.mxu2 }
  0xe0   : > { %v758_v44 = vadd.f32 %v757_v43, %v722_v40 }
  0xe1   : > { %v846_v46 = vpop.f32.mrf.mxu0 }
  0xe2   : > { %v847_v48 = vadd.f32 %v846_v46, %v814_v45  ;;  %v789_v49 = vadd.f32 %v788_v47, %v758_v44 }
  0xe4   : > { %v820_v53 = vadd.f32 %v819_v50, %v789_v49 }
  0xe6   : > { %v955_v63 = vpop.f32.mrf.mxu3 }
  0xe7   : > { %v873_v51 = vpop.f32.mrf.mxu1  ;;  %v916_v62 = vpop.f32.mrf.mxu2 }
  0xe8   : > { %v874_v52 = vadd.f32 %v873_v51, %v847_v48  ;;  %v956_v2 = vadd.f32 %v955_v63, %v916_v62 }
  0xe9   : > { %v850_v54 = vpop.f32.mrf.mxu0 }
  0xea   : > { %v2466_v55 = vmul.f32 0.35355338, %v874_v52  ;;  %v851_v56 = vadd.f32 %v850_v54, %v820_v53  ;;  %v266_v54 = vld [vmem:[%s2516_s11 + $0x8] sm:$0xff] }
  0xec   : > { %v1103_v57 = vsel %vm1090_vm1, %v2466_v55, -inf }
  0xed   : > { %1104 = vmax.xlane.f32.xlu2 %v1103_v57 }
  0xee   : > { %v959_v3 = vpop.f32.mrf.mxu3 }
  0xef   : > { %v877_v58 = vpop.f32.mrf.mxu1  ;;  %v924_v0 = vpop.f32.mrf.mxu2 }
  0xf0   : > { %v878_v59 = vadd.f32 %v877_v58, %v851_v56  ;;  %v960_v11 = vadd.f32 %v959_v3, %v924_v0  ;;  %v265_v56 = vld [vmem:[%s2516_s11] sm:$0xff] }
  0xf1   : > { %v985_v1 = vpop.f32.mrf.mxu0  ;;  %v1201_v58 = vand.u32 4294901760, %v265_v56 }
  0xf2   : > { %v2470_v60 = vmul.f32 0.35355338, %v878_v59  ;;  %v986_v6 = vadd.f32 %v985_v1, %v956_v2  ;;  %v268_v2 = vld [vmem:[%s2516_s11 + $0x18] sm:$0xff] }
  0xf3   : > { %v1395_v3 = vand.u32 4294901760, %v268_v2 }
  0xf4   : > { %v1106_v61 = vsel %vm1090_vm1, %v2470_v60, -inf }
  0xf5   : > { %1107 = vmax.xlane.f32.xlu0 %v1106_v61 }
  0xf6   : > { %v1075_v15 = vpop.f32.mrf.mxu3 }
  0xf7   : > { %v1015_v5 = vpop.f32.mrf.mxu1  ;;  %v1048_v10 = vpop.f32.mrf.mxu2 }
  0xf8   : > { %v1016_v12 = vadd.f32 %v1015_v5, %v986_v6  ;;  %v267_v5 = vld [vmem:[%s2516_s11 + $0x10] sm:$0xff]  ;;  %v2522_v6 = vsub.f32 %v268_v2, %v1395_v3 }
  0xf9   : > { %v990_v13 = vpop.f32.mrf.mxu0 }
  0xfa   : > { %v1049_v16 = vadd.f32 %v1048_v10, %v1016_v12  ;;  %v991_v17 = vadd.f32 %v990_v13, %v960_v11 }
  0xfc   : > { %v1076_v23 = vadd.f32 %v1075_v15, %v1049_v16 }
  0xfe   : > { %v2480_v27 = vmul.f32 0.35355338, %v1076_v23  ;;  %v1079_v29 = vpop.f32.mrf.mxu3 }
  0xff   : > { %v1021_v20 = vpop.f32.mrf.mxu1  ;;  %v1052_v25 = vpop.f32.mrf.mxu2 }
 0x100   : > { %v1022_v24 = vadd.f32 %v1021_v20, %v991_v17  ;;  %v1109_v32 = vsel %vm1090_vm1, %v2480_v27, -inf }
 0x102   : > { %v1053_v28 = vadd.f32 %v1052_v25, %v1022_v24 }
 0x104   : > { %v1080_v31 = vadd.f32 %v1079_v29, %v1053_v28 }
 0x106   : > { %v2489_v37 = vmul.f32 0.35355338, %v1080_v31  ;;  %v270_v31 = vld [vmem:[%s2516_s11 + $0x28] sm:$0xff] }
 0x108   : > { %v1112_v39 = vsel %vm1090_vm1, %v2489_v37, -inf }
 0x130   : > { %v1093_v7 = vpop.xlane.xlu0 %1092 }
 0x131   : > { %v1115_v8 = vsub.f32 %v2450_v4, %v1093_v7  ;;  %v1397_v7 = vand.u32 4294901760, %v267_v5 }
 0x133   : > { %v1123_v9 = vmul.f32 1.442695, %v1115_v8  ;;  %v1432_v8 = vand.u32 4294901760, %v2522_v6 }
 0x135   : > { %2178 = vpow2.f32 %v1123_v9  ;;  %v2525_v9 = vsub.f32 %v267_v5, %v1397_v7  ;;  %v1433_v10 = vsub.f32 %v2522_v6, %v1432_v8 }
 0x137   : > { %v1438_v11 = vand.u32 4294901760, %v2525_v9  ;;  %v1434_v12 = vand.u32 4294901760, %v1433_v10 }
 0x138   : > { %v1096_v18 = vpop.xlane.xlu0 %1095 }
 0x139   : > { %v1116_v19 = vsub.f32 %v2454_v14, %v1096_v18  ;;  %v1439_v13 = vsub.f32 %v2525_v9, %v1438_v11 }
 0x13b   : > { %v2476_v21 = vpop.eup %2178  ;;  %v1125_v22 = vmul.f32 1.442695, %v1116_v19  ;;  %v1440_v15 = vand.u32 4294901760, %v1439_v13 }
 0x13c   : > { %v1139_v4 = vsel %vm1090_vm1, %v2476_v21, 0.0 }
 0x13d   : > { %2180 = vpow2.f32 %v1125_v22  ;;  %1140 = vadd.xlane.f32.xlu2 %v1139_v4 }
 0x143   : > { %v2482_v30 = vpop.eup %2180 }
 0x144   : > { %v1099_v14 = vpop.xlane.xlu1 %1098  ;;  %v1142_v33 = vsel %vm1090_vm1, %v2482_v30, 0.0 }
 0x145   : > { %v1117_v34 = vsub.f32 %v2458_v26, %v1099_v14  ;;  %1110 = vmax.xlane.f32.xlu2 %v1109_v32  ;;  %1143 = vadd.xlane.f32.xlu1 %v1142_v33  ;;  %v2547_v33 = vand.u32 4294901760, %v270_v31 }
 0x147   : > { %v1127_v36 = vmul.f32 1.442695, %v1117_v34 }
 0x149   : > { %2182 = vpow2.f32 %v1127_v36  ;;  %v269_v36 = vld [vmem:[%s2516_s11 + $0x20] sm:$0xff] }
 0x14c   : > { %v1102_v38 = vpop.xlane.xlu1 %1101 }
 0x14d   : > { %v1118_v40 = vsub.f32 %v2462_v35, %v1102_v38  ;;  %1113 = vmax.xlane.f32.xlu1 %v1112_v39 }
 0x14f   : > { %v2494_v41 = vpop.eup %2182  ;;  %v1129_v42 = vmul.f32 1.442695, %v1118_v40 }
 0x150   : > { %v1145_v43 = vsel %vm1090_vm1, %v2494_v41, 0.0 }
 0x151   : > { %2184 = vpow2.f32 %v1129_v42  ;;  %1146 = vadd.xlane.f32.xlu0 %v1145_v43  ;;  %v2556_v42 = vsub.f32 %v270_v31, %v2547_v33  ;;  %v271_v31 = vld [vmem:[%s2516_s11 + $0x30] sm:$0xff] }
 0x157   : > { %v2498_v26 = vpop.eup %2184 }
 0x158   : > { %v1148_v44 = vsel %vm1090_vm1, %v2498_v26, 0.0 }
 0x159   : > { %1149 = vadd.xlane.f32.xlu2 %v1148_v44  ;;  %v2560_v44 = vand.u32 4294901760, %v269_v36 }
 0x160   : > { %v1105_v45 = vpop.xlane.xlu2 %1104 }
 0x161   : > { %v1119_v46 = vsub.f32 %v2466_v55, %v1105_v45  ;;  %v1199_v55 = vand.u32 4294901760, %v266_v54 }
 0x163   : > { %v1131_v35 = vmul.f32 1.442695, %v1119_v46  ;;  %v1235_v57 = vsub.f32 %v266_v54, %v1199_v55  ;;  %1301 = vmatpush.msra.mxu3 %v1199_v55  ;;  %1200 = vmatpush.msra.mxu0 %v1199_v55  ;;  %v1628_v46 = vand.u32 4294901760, %v2556_v42 }
 0x165   : > { %2186 = vpow2.f32 %v1131_v35  ;;  %v1236_v59 = vand.u32 4294901760, %v1235_v57  ;;  %1271 = vmatpush.msra.mxu2 %v1235_v57  ;;  %1303 = vmatpush.msra.mxu3 %v1201_v58  ;;  %v2565_v35 = vsub.f32 %v269_v36, %v2560_v44 }
 0x166   : > { %1202 = vmatpush.msra.mxu0 %v1201_v58 }
 0x167   : > { %v1237_v61 = vsub.f32 %v1235_v57, %v1236_v59  ;;  %1435 = vmatpush.msrb.mxu3 %v1434_v12 }
 0x168   : > { %v1108_v47 = vpop.xlane.xlu0 %1107  ;;  %1334 = vmatpush.msrb.mxu0 %v1236_v59 }
 0x169   : > { %v1120_v48 = vsub.f32 %v2470_v60, %v1108_v47  ;;  %v1241_v60 = vsub.f32 %v265_v56, %v1201_v58  ;;  %v1238_v63 = vand.u32 4294901760, %v1237_v61  ;;  %1441 = vmatpush.msrb.mxu3 %v1440_v15 }
 0x16b   : > { %v2504_v49 = vpop.eup %2186  ;;  %v1133_v50 = vmul.f32 1.442695, %v1120_v48  ;;  %v1242_v62 = vand.u32 4294901760, %v1241_v60  ;;  %1274 = vmatpush.msra.mxu2 %v1241_v60  ;;  %1239 = vmatpush.msra.mxu1 %v1238_v63  ;;  %v1629_v48 = vsub.f32 %v2556_v42, %v1628_v46 }
 0x16c   : > { %v1151_v51 = vsel %vm1090_vm1, %v2504_v49, 0.0 }
 0x16d   : > { %2188 = vpow2.f32 %v1133_v50  ;;  %1152 = vadd.xlane.f32.xlu0 %v1151_v51  ;;  %v1243_v0 = vsub.f32 %v1241_v60, %v1242_v62  ;;  %1338 = vmatpush.msrb.mxu0 %v1242_v62  ;;  %v1634_v50 = vand.u32 4294901760, %v2565_v35  ;;  %v1630_v56 = vand.u32 4294901760, %v1629_v48 }
 0x16e   : > { %1396 = vmatpush.msrb.mxu2 %v1395_v3 }
 0x16f   : > { %v1244_v1 = vand.u32 4294901760, %v1243_v0 }
 0x170   : > { %1398 = vmatpush.msrb.mxu2 %v1397_v7 }
 0x171   : > { %1245 = vmatpush.msra.mxu1 %v1244_v1 }
 0x173   : > { %v2508_v52 = vpop.eup %2188  ;;  %1363 = vmatpush.msrb.mxu1 %v1199_v55 }
 0x174   : > { %v1154_v53 = vsel %vm1090_vm1, %v2508_v52, 0.0 }
 0x175   : > { %1155 = vadd.xlane.f32.xlu1 %v1154_v53  ;;  %1365 = vmatpush.msrb.mxu1 %v1201_v58  ;;  %v1635_v53 = vsub.f32 %v2565_v35, %v1634_v50 }
 0x177   : > { %v1636_v61 = vand.u32 4294901760, %v1635_v53 }
 0x1b0   : > { %v1141_v16 = vpop.xlane.xlu2 %1140 }
 0x1b1   : > { %2190 = vrcp.f32 %v1141_v16 }
 0x1b7   : > { %v2191_v17 = vpop.eup %2190 }
 0x1b8   : > { %v1171_v18 = vmul.f32 %v2191_v17, %v2476_v21  ;;  %v1111_v19 = vpop.xlane.xlu2 %1110  ;;  %v1144_v20 = vpop.xlane.xlu1 %1143 }
 0x1b9   : > { %v1121_v22 = vsub.f32 %v2480_v27, %v1111_v19  ;;  %2192 = vrcp.f32 %v1144_v20 }
 0x1ba   : > { %1971 = vst.msk [vmem:[%s2535_s14] sm:$0xff] %vm1090_vm1, %v1171_v18  ;;  %v1180_v23 = vsel %vm1090_vm1, %v1171_v18, 0 }
 0x1bb   : > { %v1135_v24 = vmul.f32 1.442695, %v1121_v22  ;;  %v2540_v4 = vand.u32 4294901760, %v1180_v23 }
 0x1bd   : > { %2194 = vpow2.f32 %v1135_v24  ;;  %1247 = vmatmul.f32.vlgmr.msra.gmra.mxu1 %v2540_v4  ;;  %v1204_v21 = vsub.f32 %v1180_v23, %v2540_v4 }
 0x1be   : > { %1497 = vmatpush.msra.mxu1 %v1395_v3 }
 0x1bf   : > { %v2193_v25 = vpop.eup %2192  ;;  %1277 = vmatmul.f32.vlgmr.msra.gmra.mxu2 %v1204_v21  ;;  %v1205_v27 = vand.u32 4294901760, %v1204_v21 }
 0x1c0   : > { %v1172_v28 = vmul.f32 %v2193_v25, %v2482_v30  ;;  %v1114_v29 = vpop.xlane.xlu1 %1113  ;;  %1499 = vmatpush.msra.mxu1 %v1397_v7  ;;  %1530 = vmatpush.msra.mxu2 %v1432_v8 }
 0x1c1   : > { %v1122_v14 = vsub.f32 %v2489_v37, %v1114_v29  ;;  %1307 = vmatmul.f32.vlgmr.msra.gmra.mxu3 %v1205_v27  ;;  %v1206_v32 = vsub.f32 %v1204_v21, %v1205_v27 }
 0x1c2   : > { %1972 = vst.msk [vmem:[%s2535_s14 + $0x8] sm:$0xff] %vm1090_vm1, %v1172_v28  ;;  %v1183_v34 = vsel %vm1090_vm1, %v1172_v28, 0  ;;  %1559 = vmatpush.msra.mxu3 %v1395_v3  ;;  %1534 = vmatpush.msra.mxu2 %v1438_v11 }
 0x1c3   : > { %v2553_v38 = vpop.eup %2194  ;;  %v1137_v30 = vmul.f32 1.442695, %v1122_v14  ;;  %v1207_v39 = vand.u32 4294901760, %v1206_v32  ;;  %v1211_v40 = vand.u32 4294901760, %v1183_v34  ;;  %v1789_v32 = vand.u32 4294901760, %v271_v31 }
 0x1c4   : > { %v1147_v37 = vpop.xlane.xlu0 %1146  ;;  %v1157_v43 = vsel %vm1090_vm1, %v2553_v38, 0.0  ;;  %1561 = vmatpush.msra.mxu3 %v1397_v7 }
 0x1c5   : > { %2196 = vpow2.f32 %v1137_v30  ;;  %1208 = vmatmul.f32.vlgmr.msra.gmra.mxu0 %v1207_v39  ;;  %1158 = vadd.xlane.f32.xlu2 %v1157_v43  ;;  %v1212_v45 = vsub.f32 %v1183_v34, %v1211_v40  ;;  %v1829_v34 = vsub.f32 %v271_v31, %v1789_v32 }
 0x1c6   : > { %2198 = vrcp.f32 %v1147_v37  ;;  %1251 = vmatmul.f32.gmra.mxu1 %v1211_v40  ;;  %1467 = vmatpush.msra.mxu0 %v2522_v6 }
 0x1c7   : > { %1282 = vmatmul.f32.gmra.mxu2 %v1212_v45  ;;  %v1213_v47 = vand.u32 4294901760, %v1212_v45  ;;  %v1830_v30 = vand.u32 4294901760, %v1829_v34 }
 0x1c8   : > { %1470 = vmatpush.msra.mxu0 %v2525_v9 }
 0x1c9   : > { %1313 = vmatmul.f32.gmra.mxu3 %v1213_v47  ;;  %v1214_v51 = vsub.f32 %v1212_v45, %v1213_v47 }
 0x1cb   : > { %v2573_v54 = vpop.eup %2196  ;;  %v1215_v55 = vand.u32 4294901760, %v1214_v51 }
 0x1cc   : > { %v2199_v57 = vpop.eup %2198  ;;  %v1150_v58 = vpop.xlane.xlu2 %1149  ;;  %v1160_v59 = vsel %vm1090_vm1, %v2573_v54, 0.0 }
 0x1cd   : > { %v1173_v60 = vmul.f32 %v2199_v57, %v2494_v41  ;;  %2200 = vrcp.f32 %v1150_v58  ;;  %1216 = vmatmul.f32.gmra.mxu0 %v1215_v55  ;;  %1161 = vadd.xlane.f32.xlu0 %v1160_v59 }
 0x1ce   : > { %1367 = vmatmul.f32.vlgmr.msrb.gmra.mxu1 %v2540_v4 }
 0x1cf   : > { %1973 = vst.msk [vmem:[%s2535_s14 + $0x10] sm:$0xff] %vm1090_vm1, %v1173_v60  ;;  %v1376_v62 = vsel %vm1090_vm1, %v1173_v60, 0  ;;  %1631 = vmatpush.msrb.mxu1 %v1630_v56 }
 0x1d0   : > { %v1399_v63 = vand.u32 4294901760, %v1376_v62 }
 0x1d1   : > { %1637 = vmatpush.msrb.mxu1 %v1636_v61 }
 0x1d2   : > { %v1400_v0 = vsub.f32 %v1376_v62, %v1399_v63  ;;  %1443 = vmatmul.f32.vlgmr.msrb.gmra.mxu3 %v1399_v63 }
 0x1d3   : > { %v2201_v1 = vpop.eup %2200  ;;  %1693 = vmatpush.msrb.mxu3 %v2547_v33 }
 0x1d4   : > { %v1174_v41 = vmul.f32 %v2201_v1, %v2498_v26  ;;  %v1401_v2 = vand.u32 4294901760, %v1400_v0 }
 0x1d5   : > { %1340 = vmatmul.f32.vlgmr.msrb.gmra.mxu0 %v2540_v4  ;;  %1695 = vmatpush.msrb.mxu3 %v2560_v44 }
 0x1d6   : > { %1974 = vst.msk [vmem:[%s2535_s14 + $0x18] sm:$0xff] %vm1090_vm1, %v1174_v41  ;;  %1371 = vmatmul.f32.gmra.mxu1 %v1211_v40  ;;  %v1402_v3 = vsub.f32 %v1400_v0, %v1401_v2  ;;  %v1379_v5 = vsel %vm1090_vm1, %v1174_v41, 0  ;;  %1592 = vmatpush.msrb.mxu0 %v2547_v33 }
 0x1d7   : > { %v1407_v6 = vand.u32 4294901760, %v1379_v5 }
 0x1d8   : > { %v1403_v7 = vand.u32 4294901760, %v1402_v3  ;;  %1594 = vmatpush.msrb.mxu0 %v2560_v44 }
 0x1d9   : > { %v1408_v8 = vsub.f32 %v1379_v5, %v1407_v6 }
 0x1da   : > { %1404 = vmatmul.f32.vlgmr.msrb.gmra.mxu2 %v1403_v7  ;;  %1447 = vmatmul.f32.gmra.mxu3 %v1407_v6 }
 0x1db   : > { %v1409_v26 = vand.u32 4294901760, %v1408_v8  ;;  %1663 = vmatpush.msrb.mxu2 %v2556_v42 }
 0x1dd   : > { %1344 = vmatmul.f32.gmra.mxu0 %v1211_v40  ;;  %v1410_v9 = vsub.f32 %v1408_v8, %v1409_v26  ;;  %1666 = vmatpush.msrb.mxu2 %v2565_v35  ;;  %v1831_v40 = vsub.f32 %v1829_v34, %v1830_v30 }
 0x1de   : > { %1503 = vmatmul.f32.vlgmr.msra.gmra.mxu1 %v1401_v2 }
 0x1df   : > { %v1411_v10 = vand.u32 4294901760, %v1410_v9  ;;  %1755 = vmatpush.msra.mxu1 %v2547_v33  ;;  %v1832_v42 = vand.u32 4294901760, %v1831_v40 }
 0x1e0   : > { %v1153_v11 = vpop.xlane.xlu0 %1152 }
 0x1e1   : > { %2202 = vrcp.f32 %v1153_v11  ;;  %1757 = vmatpush.msra.mxu1 %v2560_v44 }
 0x1e2   : > { %1412 = vmatmul.f32.gmra.mxu2 %v1411_v10  ;;  %1563 = vmatmul.f32.vlgmr.msra.gmra.mxu3 %v1399_v63 }
 0x1e5   : > { %1473 = vmatmul.f32.vlgmr.msra.gmra.mxu0 %v1400_v0 }
 0x1e6   : > { %1509 = vmatmul.f32.gmra.mxu1 %v1409_v26  ;;  %1726 = vmatpush.msra.mxu0 %v1628_v46 }
 0x1e7   : > { %v2203_v12 = vpop.eup %2202 }
 0x1e8   : > { %v1175_v13 = vmul.f32 %v2203_v12, %v2504_v49  ;;  %v1156_v15 = vpop.xlane.xlu1 %1155  ;;  %1730 = vmatpush.msra.mxu0 %v1634_v50 }
 0x1e9   : > { %2204 = vrcp.f32 %v1156_v15 }
 0x1ea   : > { %1975 = vst.msk [vmem:[%s2535_s14 + $0x20] sm:$0xff] %vm1090_vm1, %v1175_v13  ;;  %1536 = vmatmul.f32.vlgmr.msra.gmra.mxu2 %v1399_v63  ;;  %1567 = vmatmul.f32.gmra.mxu3 %v1407_v6  ;;  %v1572_v16 = vsel %vm1090_vm1, %v1175_v13, 0 }
 0x1eb   : > { %v1595_v17 = vand.u32 4294901760, %v1572_v16 }
 0x1ed   : > { %1478 = vmatmul.f32.gmra.mxu0 %v1408_v8  ;;  %v1596_v18 = vsub.f32 %v1572_v16, %v1595_v17 }
 0x1ee   : > { %1639 = vmatmul.f32.vlgmr.msrb.gmra.mxu1 %v1595_v17 }
 0x1ef   : > { %v2205_v19 = vpop.eup %2204  ;;  %v1597_v20 = vand.u32 4294901760, %v1596_v18 }
 0x1f0   : > { %v1176_v22 = vmul.f32 %v2205_v19, %v2508_v52  ;;  %v272_v52 = vld [vmem:[%s2516_s11 + $0x38] sm:$0xff]  ;;  %s2230_s11 = scalar_lea.hbm %s2675_s4, 128 }
 0x1f1   : > { %v1598_v23 = vsub.f32 %v1596_v18, %v1597_v20  ;;  %v1787_v29 = vand.u32 4294901760, %v272_v52  ;;  %p2232_p1 = scmp.lt.s32.totalorder %s2230_s11, %s2226_s9 }
 0x1f2   : > { %1976 = vst.msk [vmem:[%s2535_s14 + $0x28] sm:$0xff] %vm1090_vm1, %v1176_v22  ;;  %1540 = vmatmul.f32.gmra.mxu2 %v1407_v6  ;;  %1699 = vmatmul.f32.vlgmr.msrb.gmra.mxu3 %v1597_v20  ;;  %v1575_v49 = vsel %vm1090_vm1, %v1176_v22, 0 }
 0x1f3   : > { %v1599_v24 = vand.u32 4294901760, %v1598_v23  ;;  %v1603_v4 = vand.u32 4294901760, %v1575_v49  ;;  %1788 = vmatpush.msra.mxu2 %v1787_v29  ;;  %v1823_v14 = vsub.f32 %v272_v52, %v1787_v29  ;;  %1889 = vmatpush.msrb.mxu1 %v1787_v29  ;;  %p2233_p2 = por %p2232_p1, %p2231_p0 }
 0x1f5   : > { %1600 = vmatmul.f32.vlgmr.msrb.gmra.mxu0 %v1599_v24  ;;  %v1604_v21 = vsub.f32 %v1575_v49, %v1603_v4  ;;  %v1824_v33 = vand.u32 4294901760, %v1823_v14  ;;  %1790 = vmatpush.msra.mxu2 %v1789_v32  ;;  %p2234_p3 = pnand %p2233_p2, %p2229_p13 }
 0x1f6   : > { %1643 = vmatmul.f32.gmra.mxu1 %v1603_v4  ;;  %1859 = vmatpush.msrb.mxu0 %v1823_v14 }
 0x1f7   : > { %v1605_v25 = vand.u32 4294901760, %v1604_v21  ;;  %1891 = vmatpush.msrb.mxu1 %v1789_v32  ;;  %v1825_v36 = vsub.f32 %v1823_v14, %v1824_v33 }
 0x1f8   : > { %1862 = vmatpush.msrb.mxu0 %v1829_v34 }
 0x1f9   : > { %v1606_v27 = vsub.f32 %v1604_v21, %v1605_v25  ;;  %v1826_v39 = vand.u32 4294901760, %v1825_v36 }
 0x1fa   : > { %1669 = vmatmul.f32.vlgmr.msrb.gmra.mxu2 %v1596_v18  ;;  %1705 = vmatmul.f32.gmra.mxu3 %v1605_v25 }
 0x1fb   : > { %v1607_v28 = vand.u32 4294901760, %v1606_v27  ;;  %1922 = vmatpush.msrb.mxu2 %v1824_v33  ;;  %1827 = vmatpush.msra.mxu3 %v1826_v39 }
 0x1fd   : > { %1608 = vmatmul.f32.gmra.mxu0 %v1607_v28  ;;  %1926 = vmatpush.msrb.mxu2 %v1830_v30 }
 0x1fe   : > { %1759 = vmatmul.f32.vlgmr.msra.gmra.mxu1 %v1595_v17  ;;  %1833 = vmatpush.msra.mxu3 %v1832_v42 }
 0x200   : > { %1951 = vmatpush.msrb.mxu3 %v1787_v29 }
 0x202   : > { %1674 = vmatmul.f32.gmra.mxu2 %v1604_v21  ;;  %1953 = vmatpush.msrb.mxu3 %v1789_v32 }
 0x205   : > { %1732 = vmatmul.f32.vlgmr.msra.gmra.mxu0 %v1595_v17 }
 0x206   : > { %1763 = vmatmul.f32.gmra.mxu1 %v1603_v4 }
 0x20d   : > { %1736 = vmatmul.f32.gmra.mxu0 %v1603_v4 }
 0x238   : > { %v1159_v37 = vpop.xlane.xlu2 %1158 }
 0x239   : > { %2206 = vrcp.f32 %v1159_v37 }
 0x23a   : > { %v1248_v43 = vpop.f32.mrf.mxu1 }
 0x23f   : > { %v2207_v44 = vpop.eup %2206 }
 0x240   : > { %v1177_v45 = vmul.f32 %v2207_v44, %v2553_v38  ;;  %v1162_v46 = vpop.xlane.xlu0 %1161 }
 0x241   : > { %2208 = vrcp.f32 %v1162_v46 }
 0x242   : > { %1977 = vst.msk [vmem:[%s2535_s14 + $0x30] sm:$0xff] %vm1090_vm1, %v1177_v45  ;;  %v1209_v35 = vpop.f32.mrf.mxu0  ;;  %v1768_v47 = vsel %vm1090_vm1, %v1177_v45, 0  ;;  %v1278_v59 = vpop.f32.mrf.mxu2 }
 0x243   : > { %v1252_v48 = vpop.f32.mrf.mxu1  ;;  %v1791_v50 = vand.u32 4294901760, %v1768_v47  ;;  %v1249_v58 = vadd.f32 %v1248_v43, %v1209_v35 }
 0x244   : > { %v1308_v51 = vpop.f32.mrf.mxu3 }
 0x245   : > { %1835 = vmatmul.f32.vlgmr.msra.gmra.mxu3 %v1791_v50  ;;  %v1792_v53 = vsub.f32 %v1768_v47, %v1791_v50  ;;  %v1279_v41 = vadd.f32 %v1278_v59, %v1249_v58 }
 0x247   : > { %v2209_v55 = vpop.eup %2208  ;;  %1865 = vmatmul.f32.vlgmr.msrb.gmra.mxu0 %v1792_v53  ;;  %v1793_v56 = vand.u32 4294901760, %v1792_v53  ;;  %v1309_v3 = vadd.f32 %v1308_v51, %v1279_v41 }
 0x248   : > { %v1178_v57 = vmul.f32 %v2209_v55, %v2573_v54 }
 0x249   : > { %1895 = vmatmul.f32.vlgmr.msrb.gmra.mxu1 %v1793_v56  ;;  %v1794_v38 = vsub.f32 %v1792_v53, %v1793_v56 }
 0x24a   : > { %1978 = vst.msk [vmem:[%s2535_s14 + $0x38] sm:$0xff] %vm1090_vm1, %v1178_v57  ;;  %v1217_v60 = vpop.f32.mrf.mxu0  ;;  %v1771_v61 = vsel %vm1090_vm1, %v1178_v57, 0  ;;  %v1283_v10 = vpop.f32.mrf.mxu2 }
 0x24b   : > { %v1368_v62 = vpop.f32.mrf.mxu1  ;;  %v1795_v63 = vand.u32 4294901760, %v1794_v38  ;;  %v1799_v0 = vand.u32 4294901760, %v1771_v61  ;;  %v1253_v5 = vadd.f32 %v1252_v48, %v1217_v60 }
 0x24c   : > { %v1314_v1 = vpop.f32.mrf.mxu3 }
 0x24d   : > { %1796 = vmatmul.f32.vlgmr.msra.gmra.mxu2 %v1795_v63  ;;  %1839 = vmatmul.f32.gmra.mxu3 %v1799_v0  ;;  %v1800_v2 = vsub.f32 %v1771_v61, %v1799_v0  ;;  %v1284_v11 = vadd.f32 %v1283_v10, %v1253_v5 }
 0x24f   : > { %1870 = vmatmul.f32.gmra.mxu0 %v1800_v2  ;;  %v1801_v54 = vand.u32 4294901760, %v1800_v2  ;;  %v1315_v15 = vadd.f32 %v1314_v1, %v1284_v11 }
 0x251   : > { %1901 = vmatmul.f32.gmra.mxu1 %v1801_v54  ;;  %v1802_v6 = vsub.f32 %v1800_v2, %v1801_v54 }
 0x252   : > { %v1341_v7 = vpop.f32.mrf.mxu0 }
 0x253   : > { %v1342_v8 = vadd.f32 %v1341_v7, %v1309_v3  ;;  %v1372_v26 = vpop.f32.mrf.mxu1  ;;  %v1803_v9 = vand.u32 4294901760, %v1802_v6 }
 0x255   : > { %v1369_v12 = vadd.f32 %v1368_v62, %v1342_v8  ;;  %1804 = vmatmul.f32.gmra.mxu2 %v1803_v9  ;;  %1955 = vmatmul.f32.vlgmr.msrb.gmra.mxu3 %v1791_v50  ;;  %v1444_v13 = vpop.f32.mrf.mxu3 }
 0x257   : > { %1963 = vst.msk [vmem:[%s2619_s23] sm:$0xff] %vm273_vm0, %v1369_v12 }
 0x25a   : > { %v1345_v16 = vpop.f32.mrf.mxu0 }
 0x25b   : > { %v1346_v17 = vadd.f32 %v1345_v16, %v1315_v15  ;;  %v1504_v18 = vpop.f32.mrf.mxu1 }
 0x25d   : > { %v1373_v19 = vadd.f32 %v1372_v26, %v1346_v17  ;;  %v1405_v20 = vpop.f32.mrf.mxu2  ;;  %1928 = vmatmul.f32.vlgmr.msrb.gmra.mxu2 %v1791_v50  ;;  %1959 = vmatmul.f32.gmra.mxu3 %v1799_v0  ;;  %v1448_v22 = vpop.f32.mrf.mxu3 }
 0x25e   : > { %v1445_v4 = vadd.f32 %v1444_v13, %v1405_v20 }
 0x25f   : > { %1964 = vst.msk [vmem:[%s2619_s23 + $0x8] sm:$0xff] %vm273_vm0, %v1373_v19 }
 0x262   : > { %v1474_v23 = vpop.f32.mrf.mxu0 }
 0x263   : > { %v1510_v49 = vpop.f32.mrf.mxu1  ;;  %v1475_v21 = vadd.f32 %v1474_v23, %v1445_v4 }
 0x265   : > { %v1413_v24 = vpop.f32.mrf.mxu2  ;;  %1932 = vmatmul.f32.gmra.mxu2 %v1799_v0  ;;  %v1564_v25 = vpop.f32.mrf.mxu3  ;;  %v1505_v28 = vadd.f32 %v1504_v18, %v1475_v21 }
 0x266   : > { %v1449_v29 = vadd.f32 %v1448_v22, %v1413_v24 }
 0x26a   : > { %v1479_v27 = vpop.f32.mrf.mxu0 }
 0x26b   : > { %v1640_v31 = vpop.f32.mrf.mxu1 }
 0x26d   : > { %v1537_v52 = vpop.f32.mrf.mxu2 }
 0x26e   : > { %v1538_v14 = vadd.f32 %v1537_v52, %v1505_v28 }
 0x26f   : > { %2237 = shalt.err (!%p2234_p3)
}
 0x270   : > { %s2274_s12 = smov 128   ;;  %s2275_s20 = smov 8   ;;  %v1480_v32 = vadd.f32 %v1479_v27, %v1449_v29  ;;  %v1565_v33 = vadd.f32 %v1564_v25, %v1538_v14  ;;  %v1568_v36 = vpop.f32.mrf.mxu3 }
 0x271   : > { %2137 = dma.vmem_to_hbm [thread:$0]  (%p2339_p5), %s2001_s5, 1024, %s2003_s6, %s1985_s7, %s2274_s12, %s2274_s12, %s2275_s20  }
 0x272   : > { %1965 = vst.msk [vmem:[%s2619_s23 + $0x10] sm:$0xff] %vm273_vm0, %v1565_v33  ;;  %v1601_v34 = vpop.f32.mrf.mxu0  ;;  %v1511_v30 = vadd.f32 %v1510_v49, %v1480_v32 }
 0x273   : > { %v1644_v42 = vpop.f32.mrf.mxu1  ;;  %v1641_v44 = vadd.f32 %v1640_v31, %v1601_v34 }
 0x275   : > { %v1541_v39 = vpop.f32.mrf.mxu2 }
 0x276   : > { %v1542_v40 = vadd.f32 %v1541_v39, %v1511_v30 }
 0x278   : > { %v1569_v37 = vadd.f32 %v1568_v36, %v1542_v40  ;;  %v1700_v46 = vpop.f32.mrf.mxu3 }
 0x27a   : > { %1966 = vst.msk [vmem:[%s2619_s23 + $0x18] sm:$0xff] %vm273_vm0, %v1569_v37  ;;  %v1609_v43 = vpop.f32.mrf.mxu0 }
 0x27b   : > { %v1760_v48 = vpop.f32.mrf.mxu1  ;;  %v1645_v53 = vadd.f32 %v1644_v42, %v1609_v43 }
 0x27d   : > { %v1670_v45 = vpop.f32.mrf.mxu2 }
 0x27e   : > { %v1671_v35 = vadd.f32 %v1670_v45, %v1641_v44 }
 0x280   : > { %v1701_v47 = vadd.f32 %v1700_v46, %v1671_v35  ;;  %v1706_v58 = vpop.f32.mrf.mxu3 }
 0x282   : > { %v1733_v50 = vpop.f32.mrf.mxu0 }
 0x283   : > { %v1734_v51 = vadd.f32 %v1733_v50, %v1701_v47  ;;  %v1764_v61 = vpop.f32.mrf.mxu1 }
 0x285   : > { %v1761_v55 = vadd.f32 %v1760_v48, %v1734_v51  ;;  %v1675_v56 = vpop.f32.mrf.mxu2 }
 0x286   : > { %v1676_v57 = vadd.f32 %v1675_v56, %v1645_v53 }
 0x287   : > { %1967 = vst.msk [vmem:[%s2619_s23 + $0x20] sm:$0xff] %vm273_vm0, %v1761_v55 }
 0x288   : > { %v1707_v38 = vadd.f32 %v1706_v58, %v1676_v57 }
 0x28a   : > { %v1737_v59 = vpop.f32.mrf.mxu0 }
 0x28b   : > { %v1738_v60 = vadd.f32 %v1737_v59, %v1707_v38 }
 0x28d   : > { %v1765_v62 = vadd.f32 %v1764_v61, %v1738_v60 }
 0x28f   : > { %1968 = vst.msk [vmem:[%s2619_s23 + $0x28] sm:$0xff] %vm273_vm0, %v1765_v62 }
 0x2c4   : > { %v1866_v2 = vpop.f32.mrf.mxu0 }
 0x2c6   : > { %v1896_v5 = vpop.f32.mrf.mxu1 }
 0x2c8   : > { %v1836_v63 = vpop.f32.mrf.mxu3 }
 0x2cc   : > { %v1871_v10 = vpop.f32.mrf.mxu0 }
 0x2ce   : > { %v1902_v13 = vpop.f32.mrf.mxu1 }
 0x2d0   : > { %v1797_v0 = vpop.f32.mrf.mxu2  ;;  %v1840_v1 = vpop.f32.mrf.mxu3 }
 0x2d1   : > { %v1837_v41 = vadd.f32 %v1836_v63, %v1797_v0 }
 0x2d3   : > { %v1867_v3 = vadd.f32 %v1866_v2, %v1837_v41 }
 0x2d5   : > { %v1897_v7 = vadd.f32 %v1896_v5, %v1867_v3 }
 0x2d8   : > { %v1805_v54 = vpop.f32.mrf.mxu2  ;;  %v1956_v8 = vpop.f32.mrf.mxu3 }
 0x2d9   : > { %v1841_v6 = vadd.f32 %v1840_v1, %v1805_v54 }
 0x2db   : > { %v1872_v11 = vadd.f32 %v1871_v10, %v1841_v6 }
 0x2dd   : > { %v1903_v15 = vadd.f32 %v1902_v13, %v1872_v11 }
 0x2e0   : > { %v1929_v26 = vpop.f32.mrf.mxu2  ;;  %v1960_v18 = vpop.f32.mrf.mxu3 }
 0x2e1   : > { %v1930_v9 = vadd.f32 %v1929_v26, %v1897_v7 }
 0x2e3   : > { %v1957_v12 = vadd.f32 %v1956_v8, %v1930_v9 }
 0x2e5   : > { %1969 = vst.msk [vmem:[%s2619_s23 + $0x30] sm:$0xff] %vm273_vm0, %v1957_v12 }
 0x2e8   : > { %v1933_v16 = vpop.f32.mrf.mxu2 }
 0x2e9   : > { %v1934_v17 = vadd.f32 %v1933_v16, %v1903_v15 }
 0x2eb   : > { %v1961_v19 = vadd.f32 %v1960_v18, %v1934_v17 }
 0x2ed   : > { %1970 = vst.msk [vmem:[%s2619_s23 + $0x38] sm:$0xff] %vm273_vm0, %v1961_v19 }
 0x2ee PF: > { %p2143_p4 = scmp.ge.s32.totalorder %s2272_s18, 2  ;;  %s2025_s25 = sand.u32 1, %s2260_s15  }
 0x2ef   : > { %s2026_s22 = scalar_lea.sflag [#allocation3], %s2025_s25 }
 0x2f0   : > { %p2140_p5 = pnand %p2143_p4, %p2343_p6 }
 0x2f2   : > { %p2141_p7 = pneg %p2140_p5 }
 0x2f4   : > { %2255 = dma.done.wait (%p2141_p7), %s2026_s22, 1024  }
 0x2f5   : > { %2257 = vsyncadd (%p2141_p7), %s2026_s22, 4294966272  ;;  %p15_p8 = scmp.ge.s32.totalorder %s2326_s21, 4   ;;  %s2678_s15 = smov %s2264_s16 }
 0x2f6   : > { %s2679_s16 = smov %s2268_s17  ;;  %s2680_s17 = smov %s2337_s24 }
 0x2f7   : > { %s2681_s18 = smov %s2326_s21  ;;  %17 = sbr.rel (!%p15_p8) target bundleno = 3 (0x3), region = 85 }
 0x2fc   :  { %2032 = vsyncpa [#allocation3], 1 }
 0x2fd   :  { %2034 = vsyncpa [#allocation3 + $0x1], 1 }

</bundles_post_ra>
